<compile_context>
chip_gen: v6e
topology: v6e:2x2x1
jax: 0.10.0
libtpu: 0.0.40
codegen_flags: <defaults>
</compile_context>

<pallas_src>
import jax
import jax.numpy as jnp
from jax.experimental import pallas as pl
from jax.experimental.pallas import tpu as pltpu

_LANE = 128


def _round_up(n, m):
    return (n + m - 1) // m * m


def _mlp_kernel(x_ref,
                w1_ref, b1_ref,
                w2_ref, b2_ref,
                w3_ref, b3_ref,
                w4_ref, b4_ref,
                o_ref):
    # Activations: [features, batch_tile]; batch on lanes => lane-dense I/O.
    x = x_ref[...]                                                     # [ 8, TB]
    # net1: Linear(8, 16) + ReLU
    h = jnp.dot(w1_ref[...], x, preferred_element_type=jnp.float32)   # [16, TB]
    h = jnp.maximum(h + b1_ref[...], 0.0)
    # net2: Linear(16, 32) + ReLU
    h = jnp.dot(w2_ref[...], h, preferred_element_type=jnp.float32)   # [32, TB]
    h = jnp.maximum(h + b2_ref[...], 0.0)
    # net3: Linear(32, 64)  (no activation)
    h = jnp.dot(w3_ref[...], h, preferred_element_type=jnp.float32)   # [64, TB]
    h = h + b3_ref[...]
    # net4: ReLU -> Linear(64, 8)
    h = jnp.maximum(h, 0.0)
    h = jnp.dot(w4_ref[...], h, preferred_element_type=jnp.float32)   # [ 8, TB]
    o_ref[...] = (h + b4_ref[...]).astype(o_ref.dtype)


def dummy_model_forward(x, params, *, tb=512):
    """x: [B, 8] float32.  params: wX as [out, in] (native torch layout),
    bX as [out].  Returns [B, 8]."""
    B = x.shape[0]

    # Pad batch to a lane multiple, choose a batch tile TB (lane multiple,
    # <= tb), and present x as [8, B_pad] so batch rides the lane axis.
    # (One tiny HBM transpose of the [B, 8] input — glue, not hot path.
    #  Weights are NOT transposed per call anymore.)
    b_pad = _round_up(max(B, _LANE), _LANE)
    tb = _round_up(min(tb, b_pad), _LANE)
    b_pad = _round_up(b_pad, tb)
    xt = jnp.pad(x.T, ((0, 0), (0, b_pad - B)))            # [8, b_pad]

    w1, w2, w3, w4 = params["w1"], params["w2"], params["w3"], params["w4"]
    b1 = params["b1"][:, None]                              # [out, 1] for lane bcast
    b2 = params["b2"][:, None]
    b3 = params["b3"][:, None]
    b4 = params["b4"][:, None]

    # Weights/biases: full-extent blocks with a constant block index — fetched
    # once, VMEM-resident across all batch-tile grid steps.
    resident = lambda shape: pl.BlockSpec(shape, lambda i: (0, 0))

    out_t = pl.pallas_call(
        _mlp_kernel,
        out_shape=jax.ShapeDtypeStruct((8, b_pad), jnp.float32),
        grid=(b_pad // tb,),
        in_specs=[
            pl.BlockSpec((8, tb), lambda i: (0, i)),        # x tile (pipelined)
            resident(w1.shape), resident(b1.shape),
            resident(w2.shape), resident(b2.shape),
            resident(w3.shape), resident(b3.shape),
            resident(w4.shape), resident(b4.shape),
        ],
        out_specs=pl.BlockSpec((8, tb), lambda i: (0, i)),  # lane-dense stores
        compiler_params=pltpu.CompilerParams(
            dimension_semantics=("parallel",)),             # megacore on v7x
    )(xt, w1, b1, w2, b2, w3, b3, w4, b4)

    return out_t[:, :B].T                                   # back to [B, 8]


def _init_params(key):
    """Deterministic init matching the module's layer shapes
    (nn.Linear stores weight as [out_features, in_features])."""
    # TODO(synk): torch.manual_seed(0)'s exact init values are not reproduced;
    # shapes/semantics match, values come from jax.random.
    dims = [(16, 8), (32, 16), (64, 32), (8, 64)]
    params = {}
    for i, (out_f, in_f) in enumerate(dims, start=1):
        key, kw, kb = jax.random.split(key, 3)
        bound = 1.0 / jnp.sqrt(in_f)
        params[f"w{i}"] = jax.random.uniform(
            kw, (out_f, in_f), jnp.float32, -bound, bound)
        params[f"b{i}"] = jax.random.uniform(
            kb, (out_f,), jnp.float32, -bound, bound)
    return params


def _reference_forward(x, p):
    h = jnp.maximum(x @ p["w1"].T + p["b1"], 0.0)
    h = jnp.maximum(h @ p["w2"].T + p["b2"], 0.0)
    h = h @ p["w3"].T + p["b3"]
    h = jnp.maximum(h, 0.0)
    return h @ p["w4"].T + p["b4"]


if __name__ == "__main__":
    key = jax.random.PRNGKey(0)
    key, kx = jax.random.split(key)
    params = _init_params(key)

    # Small shape consistent with the module (Linear(8, ...)): batch=8.
    batch = 8
    x = jax.random.normal(kx, (batch, 8), jnp.float32)

    out = dummy_model_forward(x, params)
    out = jax.block_until_ready(out)
    ref = _reference_forward(x, params)
    assert out.shape == (batch, 8), out.shape
    assert jnp.allclose(out, ref, atol=1e-5, rtol=1e-5), \
        float(jnp.max(jnp.abs(out - ref)))

    # Also exercise the multi-tile (grid > 1) path with a non-lane-aligned batch.
    key, kx2 = jax.random.split(key)
    x2 = jax.random.normal(kx2, (300, 8), jnp.float32)
    out2 = jax.block_until_ready(dummy_model_forward(x2, params, tb=128))
    ref2 = _reference_forward(x2, params)
    assert out2.shape == (300, 8), out2.shape
    assert jnp.allclose(out2, ref2, atol=1e-5, rtol=1e-5), \
        float(jnp.max(jnp.abs(out2 - ref2)))

    print("KERNEL_OK")
</pallas_src>

<mosaic_0001>
module attributes {stable_mosaic.version = 11 : i64} {
  func.func @_mlp_kernel(%arg0: i32, %arg1: memref<8x128xf32, #tpu.memory_space<vmem>>, %arg2: memref<16x8xf32, #tpu.memory_space<vmem>>, %arg3: memref<16x1xf32, #tpu.memory_space<vmem>>, %arg4: memref<32x16xf32, #tpu.memory_space<vmem>>, %arg5: memref<32x1xf32, #tpu.memory_space<vmem>>, %arg6: memref<64x32xf32, #tpu.memory_space<vmem>>, %arg7: memref<64x1xf32, #tpu.memory_space<vmem>>, %arg8: memref<8x64xf32, #tpu.memory_space<vmem>>, %arg9: memref<8x1xf32, #tpu.memory_space<vmem>>, %arg10: memref<8x128xf32, #tpu.memory_space<vmem>>) attributes {dimension_semantics = [#tpu.dimension_semantics<parallel>], iteration_bounds = array<i64: 1>, scalar_prefetch = 0 : i64, scratch_operands = 0 : i64, tpu.core_type = #tpu.core_type<tc>, window_params = [{transform_indices = @transform_0, window_bounds = array<i64: 8, 128>}, {pipeline_mode = #tpu.pipeline_mode<synchronous>, transform_indices = @transform_1, window_bounds = array<i64: 16, 8>}, {pipeline_mode = #tpu.pipeline_mode<synchronous>, transform_indices = @transform_2, window_bounds = array<i64: 16, 1>}, {pipeline_mode = #tpu.pipeline_mode<synchronous>, transform_indices = @transform_3, window_bounds = array<i64: 32, 16>}, {pipeline_mode = #tpu.pipeline_mode<synchronous>, transform_indices = @transform_4, window_bounds = array<i64: 32, 1>}, {pipeline_mode = #tpu.pipeline_mode<synchronous>, transform_indices = @transform_5, window_bounds = array<i64: 64, 32>}, {pipeline_mode = #tpu.pipeline_mode<synchronous>, transform_indices = @transform_6, window_bounds = array<i64: 64, 1>}, {pipeline_mode = #tpu.pipeline_mode<synchronous>, transform_indices = @transform_7, window_bounds = array<i64: 8, 64>}, {pipeline_mode = #tpu.pipeline_mode<synchronous>, transform_indices = @transform_8, window_bounds = array<i64: 8, 1>}, {transform_indices = @transform_9, window_bounds = array<i64: 8, 128>}]} {
    %c0 = arith.constant 0 : index
    %c0_0 = arith.constant 0 : index
    %0 = vector.load %arg1[%c0, %c0_0] : memref<8x128xf32, #tpu.memory_space<vmem>>, vector<8x128xf32>
    %c0_1 = arith.constant 0 : index
    %c0_2 = arith.constant 0 : index
    %1 = vector.load %arg2[%c0_1, %c0_2] : memref<16x8xf32, #tpu.memory_space<vmem>>, vector<16x8xf32>
    %cst = arith.constant dense<0.000000e+00> : vector<16x128xf32>
    %2 = tpu.matmul %1, %0, %cst {dimension_numbers = #tpu.dot_dimension_numbers<[1], [0], [0], [1], [0, 0, 1, 1], [], []>} : vector<16x8xf32>, vector<8x128xf32>, vector<16x128xf32> -> vector<16x128xf32>
    %c0_3 = arith.constant 0 : index
    %c0_4 = arith.constant 0 : index
    %3 = vector.load %arg3[%c0_3, %c0_4] : memref<16x1xf32, #tpu.memory_space<vmem>>, vector<16x1xf32>
    %4 = vector.broadcast %3 : vector<16x1xf32> to vector<16x128xf32>
    %5 = arith.addf %2, %4 : vector<16x128xf32>
    %cst_5 = arith.constant 0.000000e+00 : f32
    %6 = vector.broadcast %cst_5 : f32 to vector<16x128xf32>
    %7 = arith.maximumf %5, %6 : vector<16x128xf32>
    %c0_6 = arith.constant 0 : index
    %c0_7 = arith.constant 0 : index
    %8 = vector.load %arg4[%c0_6, %c0_7] : memref<32x16xf32, #tpu.memory_space<vmem>>, vector<32x16xf32>
    %cst_8 = arith.constant dense<0.000000e+00> : vector<32x128xf32>
    %9 = tpu.matmul %8, %7, %cst_8 {dimension_numbers = #tpu.dot_dimension_numbers<[1], [0], [0], [1], [0, 0, 1, 1], [], []>} : vector<32x16xf32>, vector<16x128xf32>, vector<32x128xf32> -> vector<32x128xf32>
    %c0_9 = arith.constant 0 : index
    %c0_10 = arith.constant 0 : index
    %10 = vector.load %arg5[%c0_9, %c0_10] : memref<32x1xf32, #tpu.memory_space<vmem>>, vector<32x1xf32>
    %11 = vector.broadcast %10 : vector<32x1xf32> to vector<32x128xf32>
    %12 = arith.addf %9, %11 : vector<32x128xf32>
    %cst_11 = arith.constant 0.000000e+00 : f32
    %13 = vector.broadcast %cst_11 : f32 to vector<32x128xf32>
    %14 = arith.maximumf %12, %13 : vector<32x128xf32>
    %c0_12 = arith.constant 0 : index
    %c0_13 = arith.constant 0 : index
    %15 = vector.load %arg6[%c0_12, %c0_13] : memref<64x32xf32, #tpu.memory_space<vmem>>, vector<64x32xf32>
    %cst_14 = arith.constant dense<0.000000e+00> : vector<64x128xf32>
    %16 = tpu.matmul %15, %14, %cst_14 {dimension_numbers = #tpu.dot_dimension_numbers<[1], [0], [0], [1], [0, 0, 1, 1], [], []>} : vector<64x32xf32>, vector<32x128xf32>, vector<64x128xf32> -> vector<64x128xf32>
    %c0_15 = arith.constant 0 : index
    %c0_16 = arith.constant 0 : index
    %17 = vector.load %arg7[%c0_15, %c0_16] : memref<64x1xf32, #tpu.memory_space<vmem>>, vector<64x1xf32>
    %18 = vector.broadcast %17 : vector<64x1xf32> to vector<64x128xf32>
    %19 = arith.addf %16, %18 : vector<64x128xf32>
    %cst_17 = arith.constant 0.000000e+00 : f32
    %20 = vector.broadcast %cst_17 : f32 to vector<64x128xf32>
    %21 = arith.maximumf %19, %20 : vector<64x128xf32>
    %c0_18 = arith.constant 0 : index
    %c0_19 = arith.constant 0 : index
    %22 = vector.load %arg8[%c0_18, %c0_19] : memref<8x64xf32, #tpu.memory_space<vmem>>, vector<8x64xf32>
    %cst_20 = arith.constant dense<0.000000e+00> : vector<8x128xf32>
    %23 = tpu.matmul %22, %21, %cst_20 {dimension_numbers = #tpu.dot_dimension_numbers<[1], [0], [0], [1], [0, 0, 1, 1], [], []>} : vector<8x64xf32>, vector<64x128xf32>, vector<8x128xf32> -> vector<8x128xf32>
    %c0_21 = arith.constant 0 : index
    %c0_22 = arith.constant 0 : index
    %24 = vector.load %arg9[%c0_21, %c0_22] : memref<8x1xf32, #tpu.memory_space<vmem>>, vector<8x1xf32>
    %25 = vector.broadcast %24 : vector<8x1xf32> to vector<8x128xf32>
    %26 = arith.addf %23, %25 : vector<8x128xf32>
    %c0_23 = arith.constant 0 : index
    %c0_24 = arith.constant 0 : index
    %27 = vector.load %arg10[%c0_23, %c0_24] : memref<8x128xf32, #tpu.memory_space<vmem>>, vector<8x128xf32>
    tpu.vector_store %arg10[%c0_23, %c0_24], %26 {strides = array<i32>} : memref<8x128xf32, #tpu.memory_space<vmem>>, vector<8x128xf32>,
    return
  }
  func.func @transform_0(%arg0: i32) -> (i32, i32) {
    %c0_i32 = arith.constant 0 : i32
    %c0_i32_0 = arith.constant 0 : i32
    return %c0_i32, %arg0 : i32, i32
  }
  func.func @transform_1(%arg0: i32) -> (i32, i32) {
    %c0_i32 = arith.constant 0 : i32
    %c0_i32_0 = arith.constant 0 : i32
    %c0_i32_1 = arith.constant 0 : i32
    return %c0_i32, %c0_i32_0 : i32, i32
  }
  func.func @transform_2(%arg0: i32) -> (i32, i32) {
    %c0_i32 = arith.constant 0 : i32
    %c0_i32_0 = arith.constant 0 : i32
    %c0_i32_1 = arith.constant 0 : i32
    return %c0_i32, %c0_i32_0 : i32, i32
  }
  func.func @transform_3(%arg0: i32) -> (i32, i32) {
    %c0_i32 = arith.constant 0 : i32
    %c0_i32_0 = arith.constant 0 : i32
    %c0_i32_1 = arith.constant 0 : i32
    return %c0_i32, %c0_i32_0 : i32, i32
  }
  func.func @transform_4(%arg0: i32) -> (i32, i32) {
    %c0_i32 = arith.constant 0 : i32
    %c0_i32_0 = arith.constant 0 : i32
    %c0_i32_1 = arith.constant 0 : i32
    return %c0_i32, %c0_i32_0 : i32, i32
  }
  func.func @transform_5(%arg0: i32) -> (i32, i32) {
    %c0_i32 = arith.constant 0 : i32
    %c0_i32_0 = arith.constant 0 : i32
    %c0_i32_1 = arith.constant 0 : i32
    return %c0_i32, %c0_i32_0 : i32, i32
  }
  func.func @transform_6(%arg0: i32) -> (i32, i32) {
    %c0_i32 = arith.constant 0 : i32
    %c0_i32_0 = arith.constant 0 : i32
    %c0_i32_1 = arith.constant 0 : i32
    return %c0_i32, %c0_i32_0 : i32, i32
  }
  func.func @transform_7(%arg0: i32) -> (i32, i32) {
    %c0_i32 = arith.constant 0 : i32
    %c0_i32_0 = arith.constant 0 : i32
    %c0_i32_1 = arith.constant 0 : i32
    return %c0_i32, %c0_i32_0 : i32, i32
  }
  func.func @transform_8(%arg0: i32) -> (i32, i32) {
    %c0_i32 = arith.constant 0 : i32
    %c0_i32_0 = arith.constant 0 : i32
    %c0_i32_1 = arith.constant 0 : i32
    return %c0_i32, %c0_i32_0 : i32, i32
  }
  func.func @transform_9(%arg0: i32) -> (i32, i32) {
    %c0_i32 = arith.constant 0 : i32
    %c0_i32_0 = arith.constant 0 : i32
    return %c0_i32, %arg0 : i32, i32
  }
}

</mosaic_0001>

<bundles_post_ra>
// kernel: tpu_custom_call.1
= control target key start
LH: loop header
LB: loop body
LE: loop exit
PB: predicated region body
PF: predicated region fallthrough
CT: control target
= control target key end

     0   :  { %vm48_vm0 = vcmask 64512   ;;  %v679_v4 = vmov 0   ;;  %s841_s0 = inlined_call_operand.vmem [shape: f32[8,128], index: 0, kind: input, shape index: {}]   ;;  %s842_s1 = inlined_call_operand.vmem [shape: f32[16,8], index: 1, kind: input, shape index: {}]   ;;  %s843_s2 = inlined_call_operand.vmem [shape: f32[16,1], index: 2, kind: input, shape index: {}]   ;;  %s844_s3 = inlined_call_operand.vmem [shape: f32[32,16], index: 3, kind: input, shape index: {}]   ;;  %s845_s4 = inlined_call_operand.vmem [shape: f32[32,1], index: 4, kind: input, shape index: {}]   ;;  %s846_s5 = inlined_call_operand.vmem [shape: f32[64,32], index: 5, kind: input, shape index: {}]   ;;  %s847_s6 = inlined_call_operand.vmem [shape: f32[64,1], index: 6, kind: input, shape index: {}]   ;;  %s848_s7 = inlined_call_operand.vmem [shape: f32[8,64], index: 7, kind: input, shape index: {}]   ;;  %s849_s8 = inlined_call_operand.vmem [shape: f32[8,1], index: 8, kind: input, shape index: {}]   ;;  %s850_s9 = inlined_call_operand.hbm [shape: f32[8,128], index: 9, kind: output, shape index: {}]  }
   0x1   :  { %v33_v0 = vld [vmem:[%s841_s0] sm:$0xff]  ;;  %v35_v2 = vld [vmem:[%s842_s1 + $0x8] sm:$0xff]  ;;  %655 = vset.pattern.permute.xlu0 %v679_v4 }
   0x2   :  { %v34_v1 = vld [vmem:[%s842_s1] sm:$0xff]  ;;  %597 = vmatprep.subr.mxu0 %v33_v0  ;;  %v37_v3 = vld [vmem:[%s843_s2 + $0x8] sm:$0xff] }
   0x3   :  { %599 = vmatprep.mubr.msk.f32.mxu0 %vm48_vm0, %v34_v1  ;;  %598 = vmatpush3.msra.mxu0 %v33_v0 }
   0x4   :  { %600 = vmatmul.mubr.msk.f32.vlgmr.msra.gmra.mxu0 %vm48_vm0, %v35_v2  ;;  %45 = vperm.xlu0 %655, %v37_v3  }
   0x5   :  { %14 = vsyncpa [#allocation3], 0  ;;  %v36_v5 = vld [vmem:[%s843_s2] sm:$0xff]  ;;  %656 = vset.pattern.permute.xlu1 %v679_v4  ;;  %v137_v6 = vld [vmem:[%s845_s4 + $0x8] sm:$0xff]  ;;  %vm160_vm1 = vcmask 130048   ;;  %vm318_vm2 = vcmask 261120  }
   0x6   :  { %v277_v7 = vld [vmem:[%s847_s6 + $0x38] sm:$0xff]  ;;  %v275_v8 = vld [vmem:[%s847_s6 + $0x28] sm:$0xff]  ;;  %v457_v11 = vld [vmem:[%s849_s8] sm:$0xff]  ;;  %v680_v55 = vmov 0.0   ;;  %vm681_vm3 = vmmov 0   ;;  %vm463_vm4 = vcmask 523264  }
   0x7   :  { %v273_v9 = vld [vmem:[%s847_s6 + $0x18] sm:$0xff]  ;;  %v271_v10 = vld [vmem:[%s847_s6 + $0x8] sm:$0xff]  ;;  %v132_v12 = vld [vmem:[%s844_s3] sm:$0xff]  ;;  %s682_s0 = smov [#allocation2]  }
   0x8   :  { %40 = vperm.xlu0 %655, %v36_v5   ;;  %606 = vmatprep.mubr.msk.f32.mxu1 %vm160_vm1, %v132_v12  ;;  %v139_v13 = vld [vmem:[%s845_s4 + $0x18] sm:$0xff]  ;;  %v138_v14 = vld [vmem:[%s845_s4 + $0x10] sm:$0xff]  ;;  %v136_v15 = vld [vmem:[%s845_s4] sm:$0xff]  ;;  %s544_s17 = sshll.u32 %s682_s0, 4  ;;  %s545_s17 = int_to_ptr.vmem [resolvable:$true] %s544_s17 }
   0x9   :  { %157 = vperm.xlu1 %656, %v139_v13   ;;  %v276_v16 = vld [vmem:[%s847_s6 + $0x30] sm:$0xff]  ;;  %v274_v17 = vld [vmem:[%s847_s6 + $0x20] sm:$0xff]  ;;  %v133_v28 = vld [vmem:[%s844_s3 + $0x8] sm:$0xff]  ;;  %s657_s18 = scalar_lea.vmem %s545_s17, 128  ;;  %p662_p1 = scmp.lt.s32.totalorder %s545_s17, %s545_s17 }
   0xa   :  { %v272_v18 = vld [vmem:[%s847_s6 + $0x10] sm:$0xff]  ;;  %v270_v19 = vld [vmem:[%s847_s6] sm:$0xff]  ;;  %v135_v30 = vld [vmem:[%s844_s3 + $0x18] sm:$0xff]  ;;  %p658_p0 = scmp.ne.s32.totalorder %s545_s17, %s657_s18  ;;  %p663_p2 = scmp.lt.s32.totalorder %s657_s18, %s657_s18 }
   0xb   :  { %v134_v29 = vld [vmem:[%s844_s3 + $0x10] sm:$0xff]  ;;  %v262_v31 = vld [vmem:[%s846_s5] sm:$0xff]  ;;  %v263_v48 = vld [vmem:[%s846_s5 + $0x8] sm:$0xff] }
   0xc   :  { %147 = vperm.xlu0 %655, %v137_v6   ;;  %620 = vmatprep.mubr.msk.f32.mxu0 %vm318_vm2, %v262_v31  ;;  %v264_v49 = vld [vmem:[%s846_s5 + $0x10] sm:$0xff]  ;;  %v265_v50 = vld [vmem:[%s846_s5 + $0x18] sm:$0xff]  ;;  %v266_v51 = vld [vmem:[%s846_s5 + $0x20] sm:$0xff]  ;;  %p664_p3 = por %p663_p2, %p662_p1 }
   0xd   :  { %152 = vperm.xlu1 %656, %v138_v14   ;;  %v267_v52 = vld [vmem:[%s846_s5 + $0x28] sm:$0xff]  ;;  %v268_v53 = vld [vmem:[%s846_s5 + $0x30] sm:$0xff]  ;;  %v269_v54 = vld [vmem:[%s846_s5 + $0x38] sm:$0xff] }
   0xe   :  { %p665_p4 = pnand %p664_p3, %p658_p0 }
  0x10   :  { %315 = vperm.xlu0 %655, %v277_v7  }
  0x11   :  { %142 = vperm.xlu1 %656, %v136_v15  }
  0x14   :  { %305 = vperm.xlu0 %655, %v275_v8  }
  0x15   :  { %310 = vperm.xlu1 %656, %v276_v16  }
  0x18   :  { %295 = vperm.xlu0 %655, %v273_v9  }
  0x19   :  { %300 = vperm.xlu1 %656, %v274_v17  }
  0x1c   :  { %285 = vperm.xlu0 %655, %v271_v10  }
  0x1d   :  { %290 = vperm.xlu1 %656, %v272_v18  }
  0x20   :  { %460 = vperm.xlu0 %655, %v457_v11  }
  0x21   :  { %280 = vperm.xlu1 %656, %v270_v19  }
  0x7f   :  { %v46_v20 = vpop.permute.xlu0 %45 }
  0x83   :  { %v41_v23 = vpop.permute.xlu0 %40 }
  0x84   :  { %v158_v32 = vpop.permute.xlu1 %157 }
  0x87   :  { %v148_v38 = vpop.permute.xlu0 %147 }
  0x88   :  { %v153_v34 = vpop.permute.xlu1 %152 }
  0x8b   :  { %v316_v58 = vpop.permute.xlu0 %315 }
  0x8c   :  { %v143_v43 = vpop.permute.xlu1 %142 }
  0x8f   :  { %v306_v63 = vpop.permute.xlu0 %305 }
  0x90   :  { %v311_v60 = vpop.permute.xlu1 %310 }
  0x93   :  { %v296_v8 = vpop.permute.xlu0 %295 }
  0x94   :  { %v301_v1 = vpop.permute.xlu1 %300 }
  0x97   :  { %v286_v16 = vpop.permute.xlu0 %285 }
  0x98   :  { %v291_v11 = vpop.permute.xlu1 %290 }
  0x9c   :  { %v281_v19 = vpop.permute.xlu1 %280 }
  0xc4   :  { %v601_v21 = vpop.f32.mrf.mxu0 }
  0xc5   :  { %v127_v22 = vadd.f32 %v601_v21, %v46_v20 }
  0xc6   :  { %v121_v24 = vpop.f32.mrf.mxu0 }
  0xc7   :  { %v131_v25 = vmax.f32 %v127_v22, 0.0  ;;  %v122_v26 = vadd.f32 %v121_v24, %v41_v23  ;;  %v456_v24 = vld [vmem:[%s848_s7] sm:$0xff] }
  0xc9   :  { %v130_v27 = vmax.f32 %v122_v26, 0.0  ;;  %602 = vmatprep.subr.mxu1 %v131_v25 }
  0xca   :  { %603 = vmatpush3.msra.mxu1 %v131_v25  ;;  %v461_v25 = vpop.permute.xlu0 %460 }
  0xcb   :  { %604 = vmatprep.subr.mxu1 %v130_v27 }
  0xcc   :  { %605 = vmatpush3.msra.mxu1 %v130_v27 }
  0xcd   :  { %607 = vmatmul.mubr.msk.f32.vlgmr.msra.gmra.mxu1 %vm160_vm1, %v133_v28  ;;  %632 = vmatprep.subr.mxu1 %v680_v55 }
  0xce   :  { %609 = vmatprep.mubr.msk.f32.mxu1 %vm160_vm1, %v134_v29 }
  0xd1   :  { %610 = vmatmul.mubr.msk.f32.gmra.mxu1 %vm160_vm1, %v135_v30 }
  0xd2   :  { %648 = vmatprep.mubr.msk.f32.mxu1 %vm681_vm3, %v680_v55 }
 0x18d   :  { %v608_v33 = vpop.f32.mrf.mxu1 }
 0x18e   :  { %v245_v40 = vadd.f32 %v608_v33, %v148_v38 }
 0x18f   :  { %v239_v35 = vpop.f32.mrf.mxu1 }
 0x190   :  { %v240_v44 = vadd.f32 %v239_v35, %v143_v43  ;;  %v259_v46 = vmax.f32 %v245_v40, 0.0 }
 0x191   :  { %v611_v36 = vpop.f32.mrf.mxu1 }
 0x192   :  { %v255_v37 = vadd.f32 %v611_v36, %v158_v32  ;;  %v258_v47 = vmax.f32 %v240_v44, 0.0 }
 0x193   :  { %v249_v39 = vpop.f32.mrf.mxu1 }
 0x194   :  { %v261_v41 = vmax.f32 %v255_v37, 0.0  ;;  %v250_v42 = vadd.f32 %v249_v39, %v153_v34 }
 0x196   :  { %v260_v45 = vmax.f32 %v250_v42, 0.0  ;;  %612 = vmatprep.subr.mxu0 %v261_v41 }
 0x197   :  { %613 = vmatpush3.msra.mxu0 %v261_v41 }
 0x198   :  { %614 = vmatprep.subr.mxu0 %v260_v45 }
 0x199   :  { %615 = vmatpush3.msra.mxu0 %v260_v45 }
 0x19a   :  { %616 = vmatprep.subr.mxu0 %v259_v46 }
 0x19b   :  { %617 = vmatpush3.msra.mxu0 %v259_v46 }
 0x19c   :  { %618 = vmatprep.subr.mxu0 %v258_v47 }
 0x19d   :  { %619 = vmatpush3.msra.mxu0 %v258_v47 }
 0x19e   :  { %621 = vmatmul.mubr.msk.f32.vlgmr.msra.gmra.mxu0 %vm318_vm2, %v263_v48 }
 0x19f   :  { %623 = vmatprep.mubr.msk.f32.mxu0 %vm318_vm2, %v264_v49 }
 0x1a2   :  { %624 = vmatmul.mubr.msk.f32.gmra.mxu0 %vm318_vm2, %v265_v50 }
 0x1a3   :  { %626 = vmatprep.mubr.msk.f32.mxu0 %vm318_vm2, %v266_v51 }
 0x1a6   :  { %627 = vmatmul.mubr.msk.f32.gmra.mxu0 %vm318_vm2, %v267_v52 }
 0x1a7   :  { %629 = vmatprep.mubr.msk.f32.mxu0 %vm318_vm2, %v268_v53 }
 0x1aa   :  { %630 = vmatmul.mubr.msk.f32.gmra.mxu0 %vm318_vm2, %v269_v54 }
 0x25e   :  { %v622_v56 = vpop.f32.mrf.mxu0 }
 0x25f   :  { %v415_v17 = vadd.f32 %v622_v56, %v286_v16 }
 0x260   :  { %v409_v57 = vpop.f32.mrf.mxu0 }
 0x261   :  { %v410_v20 = vadd.f32 %v409_v57, %v281_v19  ;;  %v449_v22 = vmax.f32 %v415_v17, 0.0 }
 0x262   :  { %v625_v59 = vpop.f32.mrf.mxu0 }
 0x263   :  { %v425_v12 = vadd.f32 %v625_v59, %v296_v8  ;;  %v448_v23 = vmax.f32 %v410_v20, 0.0 }
 0x264   :  { %v419_v61 = vpop.f32.mrf.mxu0 }
 0x265   :  { %v420_v14 = vadd.f32 %v419_v61, %v291_v11  ;;  %v451_v18 = vmax.f32 %v425_v12, 0.0 }
 0x266   :  { %v628_v62 = vpop.f32.mrf.mxu0 }
 0x267   :  { %v435_v5 = vadd.f32 %v628_v62, %v306_v63  ;;  %v450_v21 = vmax.f32 %v420_v14, 0.0 }
 0x268   :  { %v429_v0 = vpop.f32.mrf.mxu0 }
 0x269   :  { %v430_v9 = vadd.f32 %v429_v0, %v301_v1  ;;  %v453_v13 = vmax.f32 %v435_v5, 0.0 }
 0x26a   :  { %v631_v2 = vpop.f32.mrf.mxu0 }
 0x26b   :  { %v445_v3 = vadd.f32 %v631_v2, %v316_v58  ;;  %v452_v15 = vmax.f32 %v430_v9, 0.0 }
 0x26c   :  { %v439_v4 = vpop.f32.mrf.mxu0 }
 0x26d   :  { %v455_v6 = vmax.f32 %v445_v3, 0.0  ;;  %v440_v7 = vadd.f32 %v439_v4, %v311_v60 }
 0x26f   :  { %v454_v10 = vmax.f32 %v440_v7, 0.0  ;;  %633 = vmatpush3.msra.mxu1 %v455_v6 }
 0x270   :  { %634 = vmatprep.subr.mxu1 %v680_v55 }
 0x271   :  { %635 = vmatpush3.msra.mxu1 %v454_v10 }
 0x272   :  { %636 = vmatprep.subr.mxu1 %v680_v55 }
 0x273   :  { %637 = vmatpush3.msra.mxu1 %v453_v13 }
 0x274   :  { %638 = vmatprep.subr.mxu1 %v680_v55 }
 0x275   :  { %639 = vmatpush3.msra.mxu1 %v452_v15 }
 0x276   :  { %640 = vmatprep.subr.mxu1 %v680_v55 }
 0x277   :  { %641 = vmatpush3.msra.mxu1 %v451_v18 }
 0x278   :  { %642 = vmatprep.subr.mxu1 %v680_v55 }
 0x279   :  { %643 = vmatpush3.msra.mxu1 %v450_v21 }
 0x27a   :  { %644 = vmatprep.subr.mxu1 %v680_v55 }
 0x27b   :  { %645 = vmatpush3.msra.mxu1 %v449_v22 }
 0x27c   :  { %646 = vmatprep.subr.mxu1 %v680_v55 }
 0x27d   :  { %647 = vmatpush3.msra.mxu1 %v448_v23 }
 0x27e   :  { %649 = vmatmul.mubr.msk.f32.vlgmr.msra.gmra.mxu1 %vm463_vm4, %v456_v24 }
 0x33e   :  { %v533_v26 = vpop.f32.mrf.mxu1 }
 0x33f   :  { %v534_v27 = vadd.f32 %v533_v26, %v461_v25 }
 0x340   :  { %v650_v28 = vpop.f32.mrf.mxu1 }
 0x341   :  { %537 = vst [vmem:[#allocation2] sm:$0xff] %v534_v27 }
 0x342   :  { %668 = shalt.err (!%p665_p4)
}
 0x343   :  { %547 = dma.vmem_to_hbm [thread:$0]  %s545_s17, 128, %s850_s9, [#allocation3]  }
 0x344   :  { %677 = dma.done.wait [#allocation3], 128  }
 0x345   :  { %678 = vsyncadd [#allocation3], 4294967168 }
 0x346   :  { %551 = vsyncpa [#allocation3], 1 }

</bundles_post_ra>
